<compile_context>
chip_gen: v6e
topology: v6e:2x2x1
jax: 0.10.0
libtpu: 0.0.40
codegen_flags: <defaults>
</compile_context>

<pallas_src>
import jax
import jax.numpy as jnp
from jax.experimental import pallas as pl
from jax.experimental.pallas import tpu as pltpu


def _round_up(x, m):
    return ((x + m - 1) // m) * m


def _actor_kernel(maxa_ref, s_ref, w1_ref, b1_ref, w2_ref, b2_ref,
                  w3_ref, b3_ref, o_ref):
    """Fused MLP: sigmoid(relu(relu(x@W1+b1)@W2+b2)@W3+b3) * max_action."""
    max_action = maxa_ref[0, 0]                       # f32 scalar from SMEM

    # f32 state -> bf16 in-register (free VPU work; keeps the streamed DMA
    # minimal since the state is the only per-tile input).
    x = s_ref[...].astype(jnp.bfloat16)               # (TB, S)

    # fc1 + relu  (bf16 MXU operands, f32 accumulate / epilogue)
    h = jnp.dot(x, w1_ref[...], preferred_element_type=jnp.float32) + b1_ref[...]
    h = jnp.maximum(h, 0.0)
    # fc2 + relu
    h = jnp.dot(h.astype(jnp.bfloat16), w2_ref[...],
                preferred_element_type=jnp.float32) + b2_ref[...]
    h = jnp.maximum(h, 0.0)
    # fc3 + sigmoid * max_action
    z = jnp.dot(h.astype(jnp.bfloat16), w3_ref[...],
                preferred_element_type=jnp.float32) + b3_ref[...]
    o_ref[...] = (jax.nn.sigmoid(z) * max_action).astype(o_ref.dtype)


def prepare_actor_params(params, max_action):
    """One-time padding/casting of the Actor params (hoisted out of hot loop).

    params: (w1, b1, w2, b2, w3, b3) with w_i of shape (in, out) [= PyTorch W.T]
            and b_i of shape (out,) or (1, out).
    Returns a tuple of device arrays ready to pass to actor_forward every call.
    Only the hidden dim is padded to 128 lanes; state/action dims stay exact.
    """
    w1, b1, w2, b2, w3, b3 = params
    S, H = w1.shape
    A = w3.shape[1]
    Hp = _round_up(H, 128)

    bf16, f32 = jnp.bfloat16, jnp.float32

    def pad2(x, rows, cols, dtype):
        x = jnp.asarray(x, dtype)
        if x.ndim == 1:
            x = x.reshape(1, -1)
        return jnp.pad(x, ((0, rows - x.shape[0]), (0, cols - x.shape[1])))

    return (
        jnp.asarray(max_action, f32).reshape(1, 1),   # SMEM scalar
        pad2(w1, S, Hp, bf16),                        # (S,  Hp)
        pad2(b1, 1, Hp, f32),                         # (1,  Hp)
        pad2(w2, Hp, Hp, bf16),                       # (Hp, Hp)
        pad2(b2, 1, Hp, f32),                         # (1,  Hp)
        pad2(w3, Hp, A, bf16),                        # (Hp, A)  action dim unpadded
        pad2(b3, 1, A, f32),                          # (1,  A)
    )


def actor_forward(state, prepared, *, block_b=128):
    """Fused Actor MLP forward as a single batch-tiled Pallas TPU kernel.

    state:    (B, state_dim) float32
    prepared: output of prepare_actor_params (padded/cast once at init).
    block_b:  batch tile size (<=128 recommended; on v7x with B<=128 pass
              ~ceil(B/2) rounded to 8 so both TensorCores get a tile).
    """
    maxa, w1_p, b1_p, w2_p, b2_p, w3_p, b3_p = prepared
    B, S = state.shape
    assert S == w1_p.shape[0], "state_dim mismatch with prepared params"
    Hp = w1_p.shape[1]
    A = w3_p.shape[1]

    TB = min(_round_up(block_b, 8), _round_up(B, 8))
    Bp = _round_up(B, TB)

    state_p = state.astype(jnp.float32)
    if Bp != B:
        state_p = jnp.pad(state_p, ((0, Bp - B), (0, 0)))   # batch rows only

    def resident(shape):
        # Same block every grid step -> DMA'd from HBM once, stays in VMEM.
        return pl.BlockSpec(shape, lambda i: (0, 0))

    out = pl.pallas_call(
        _actor_kernel,
        out_shape=jax.ShapeDtypeStruct((Bp, A), jnp.float32),
        grid=(Bp // TB,),
        in_specs=[
            pl.BlockSpec(memory_space=pltpu.MemorySpace.SMEM),  # max_action
            pl.BlockSpec((TB, S), lambda i: (i, 0)),            # state tile (streamed)
            resident((S, Hp)),                                  # w1
            resident((1, Hp)),                                  # b1
            resident((Hp, Hp)),                                 # w2
            resident((1, Hp)),                                  # b2
            resident((Hp, A)),                                  # w3
            resident((1, A)),                                   # b3
        ],
        out_specs=pl.BlockSpec((TB, A), lambda i: (i, 0)),
        compiler_params=pltpu.CompilerParams(
            dimension_semantics=("parallel",),   # batch tiles -> both TCs on v7x
        ),
    )(maxa, state_p, w1_p, b1_p, w2_p, b2_p, w3_p, b3_p)

    return out if Bp == B else out[:B]


def init_actor_params(key, state_dim, hidden_dim, action_dim):
    """Deterministic init mimicking nn.Linear default (uniform +/- 1/sqrt(fan_in))."""
    ks = jax.random.split(key, 6)

    def linear(kw, kb, fan_in, fan_out):
        bound = 1.0 / jnp.sqrt(float(fan_in))
        w = jax.random.uniform(kw, (fan_in, fan_out), jnp.float32, -bound, bound)
        b = jax.random.uniform(kb, (1, fan_out), jnp.float32, -bound, bound)
        return w, b

    w1, b1 = linear(ks[0], ks[1], state_dim, hidden_dim)
    w2, b2 = linear(ks[2], ks[3], hidden_dim, hidden_dim)
    w3, b3 = linear(ks[4], ks[5], hidden_dim, action_dim)
    return (w1, b1, w2, b2, w3, b3)


def actor_reference_bf16(state, params, max_action):
    """Pure-JAX reference with the identical bf16-operand / f32-accumulate recipe."""
    w1, b1, w2, b2, w3, b3 = params
    bf16 = jnp.bfloat16
    h = jnp.dot(state.astype(bf16), w1.astype(bf16),
                preferred_element_type=jnp.float32) + b1
    h = jnp.maximum(h, 0.0)
    h = jnp.dot(h.astype(bf16), w2.astype(bf16),
                preferred_element_type=jnp.float32) + b2
    h = jnp.maximum(h, 0.0)
    z = jnp.dot(h.astype(bf16), w3.astype(bf16),
                preferred_element_type=jnp.float32) + b3
    return jax.nn.sigmoid(z) * max_action


def actor_reference_f32(state, params, max_action):
    """Pure-f32 reference matching the PyTorch module arithmetic (looser tol)."""
    w1, b1, w2, b2, w3, b3 = params
    h = jnp.maximum(state @ w1 + b1, 0.0)
    h = jnp.maximum(h @ w2 + b2, 0.0)
    return jax.nn.sigmoid(h @ w3 + b3) * max_action


if __name__ == "__main__":
    # Small shapes consistent with the Actor module.
    state_dim, hidden_dim, action_dim = 8, 32, 4
    max_action = 2.0

    key = jax.random.PRNGKey(0)
    k_state, k_params, k_state2 = jax.random.split(key, 3)
    params = init_actor_params(k_params, state_dim, hidden_dim, action_dim)

    # One-time (per param-update) padding/casting — outside the hot loop.
    prepared = prepare_actor_params(params, max_action)

    # Case 1: tiny batch (single grid step, padded batch rows only).
    state = jax.random.normal(k_state, (2, state_dim), jnp.float32)
    out = jax.block_until_ready(actor_forward(state, prepared))
    assert out.shape == (2, action_dim)
    assert jnp.allclose(out, actor_reference_bf16(state, params, max_action),
                        atol=1e-3, rtol=1e-3), "mismatch vs bf16 reference (B=2)"
    assert jnp.allclose(out, actor_reference_f32(state, params, max_action),
                        atol=1e-2, rtol=1e-2), "mismatch vs f32 reference (B=2)"

    # Case 2: multi-tile grid with a ragged batch (exercises pipelining + padding).
    state2 = jax.random.normal(k_state2, (200, state_dim), jnp.float32)
    out2 = jax.block_until_ready(actor_forward(state2, prepared))
    assert out2.shape == (200, action_dim)
    assert jnp.allclose(out2, actor_reference_bf16(state2, params, max_action),
                        atol=1e-3, rtol=1e-3), "mismatch vs bf16 reference (B=200)"
    assert jnp.allclose(out2, actor_reference_f32(state2, params, max_action),
                        atol=1e-2, rtol=1e-2), "mismatch vs f32 reference (B=200)"

    print("KERNEL_OK")
</pallas_src>

<mosaic_0001>
module attributes {stable_mosaic.version = 11 : i64} {
  func.func @_actor_kernel(%arg0: i32, %arg1: memref<1x1xf32, #tpu.memory_space<smem>>, %arg2: memref<8x8xf32, #tpu.memory_space<vmem>>, %arg3: memref<8x128xbf16, #tpu.memory_space<vmem>>, %arg4: memref<1x128xf32, #tpu.memory_space<vmem>>, %arg5: memref<128x128xbf16, #tpu.memory_space<vmem>>, %arg6: memref<1x128xf32, #tpu.memory_space<vmem>>, %arg7: memref<128x4xbf16, #tpu.memory_space<vmem>>, %arg8: memref<1x4xf32, #tpu.memory_space<vmem>>, %arg9: memref<8x4xf32, #tpu.memory_space<vmem>>) attributes {dimension_semantics = [#tpu.dimension_semantics<parallel>], iteration_bounds = array<i64: 1>, scalar_prefetch = 0 : i64, scratch_operands = 0 : i64, tpu.core_type = #tpu.core_type<tc>, window_params = [{transform_indices = @transform_0, window_bounds = array<i64: 1, 1>}, {transform_indices = @transform_1, window_bounds = array<i64: 8, 8>}, {pipeline_mode = #tpu.pipeline_mode<synchronous>, transform_indices = @transform_2, window_bounds = array<i64: 8, 128>}, {pipeline_mode = #tpu.pipeline_mode<synchronous>, transform_indices = @transform_3, window_bounds = array<i64: 1, 128>}, {pipeline_mode = #tpu.pipeline_mode<synchronous>, transform_indices = @transform_4, window_bounds = array<i64: 128, 128>}, {pipeline_mode = #tpu.pipeline_mode<synchronous>, transform_indices = @transform_5, window_bounds = array<i64: 1, 128>}, {pipeline_mode = #tpu.pipeline_mode<synchronous>, transform_indices = @transform_6, window_bounds = array<i64: 128, 4>}, {pipeline_mode = #tpu.pipeline_mode<synchronous>, transform_indices = @transform_7, window_bounds = array<i64: 1, 4>}, {transform_indices = @transform_8, window_bounds = array<i64: 8, 4>}]} {
    %c0 = arith.constant 0 : index
    %c0_0 = arith.constant 0 : index
    %0 = memref.load %arg1[%c0, %c0_0] : memref<1x1xf32, #tpu.memory_space<smem>>
    %c0_1 = arith.constant 0 : index
    %c0_2 = arith.constant 0 : index
    %1 = vector.load %arg2[%c0_1, %c0_2] : memref<8x8xf32, #tpu.memory_space<vmem>>, vector<8x8xf32>
    %2 = arith.truncf %1 : vector<8x8xf32> to vector<8x8xbf16>
    %c0_3 = arith.constant 0 : index
    %c0_4 = arith.constant 0 : index
    %3 = vector.load %arg3[%c0_3, %c0_4] : memref<8x128xbf16, #tpu.memory_space<vmem>>, vector<8x128xbf16>
    %cst = arith.constant dense<0.000000e+00> : vector<8x128xf32>
    %4 = tpu.matmul %2, %3, %cst {dimension_numbers = #tpu.dot_dimension_numbers<[1], [0], [0], [1], [0, 0, 1, 1], [], []>} : vector<8x8xbf16>, vector<8x128xbf16>, vector<8x128xf32> -> vector<8x128xf32>
    %c0_5 = arith.constant 0 : index
    %c0_6 = arith.constant 0 : index
    %5 = vector.load %arg4[%c0_5, %c0_6] : memref<1x128xf32, #tpu.memory_space<vmem>>, vector<1x128xf32>
    %6 = vector.broadcast %5 : vector<1x128xf32> to vector<8x128xf32>
    %7 = arith.addf %4, %6 : vector<8x128xf32>
    %cst_7 = arith.constant 0.000000e+00 : f32
    %8 = vector.broadcast %cst_7 : f32 to vector<8x128xf32>
    %9 = arith.maximumf %7, %8 : vector<8x128xf32>
    %10 = arith.truncf %9 : vector<8x128xf32> to vector<8x128xbf16>
    %c0_8 = arith.constant 0 : index
    %c0_9 = arith.constant 0 : index
    %11 = vector.load %arg5[%c0_8, %c0_9] : memref<128x128xbf16, #tpu.memory_space<vmem>>, vector<128x128xbf16>
    %cst_10 = arith.constant dense<0.000000e+00> : vector<8x128xf32>
    %12 = tpu.matmul %10, %11, %cst_10 {dimension_numbers = #tpu.dot_dimension_numbers<[1], [0], [0], [1], [0, 0, 1, 1], [], []>} : vector<8x128xbf16>, vector<128x128xbf16>, vector<8x128xf32> -> vector<8x128xf32>
    %c0_11 = arith.constant 0 : index
    %c0_12 = arith.constant 0 : index
    %13 = vector.load %arg6[%c0_11, %c0_12] : memref<1x128xf32, #tpu.memory_space<vmem>>, vector<1x128xf32>
    %14 = vector.broadcast %13 : vector<1x128xf32> to vector<8x128xf32>
    %15 = arith.addf %12, %14 : vector<8x128xf32>
    %cst_13 = arith.constant 0.000000e+00 : f32
    %16 = vector.broadcast %cst_13 : f32 to vector<8x128xf32>
    %17 = arith.maximumf %15, %16 : vector<8x128xf32>
    %18 = arith.truncf %17 : vector<8x128xf32> to vector<8x128xbf16>
    %c0_14 = arith.constant 0 : index
    %c0_15 = arith.constant 0 : index
    %19 = vector.load %arg7[%c0_14, %c0_15] : memref<128x4xbf16, #tpu.memory_space<vmem>>, vector<128x4xbf16>
    %cst_16 = arith.constant dense<0.000000e+00> : vector<8x4xf32>
    %20 = tpu.matmul %18, %19, %cst_16 {dimension_numbers = #tpu.dot_dimension_numbers<[1], [0], [0], [1], [0, 0, 1, 1], [], []>} : vector<8x128xbf16>, vector<128x4xbf16>, vector<8x4xf32> -> vector<8x4xf32>
    %c0_17 = arith.constant 0 : index
    %c0_18 = arith.constant 0 : index
    %21 = vector.load %arg8[%c0_17, %c0_18] : memref<1x4xf32, #tpu.memory_space<vmem>>, vector<1x4xf32>
    %22 = vector.broadcast %21 : vector<1x4xf32> to vector<8x4xf32>
    %23 = arith.addf %20, %22 : vector<8x4xf32>
    %24 = arith.negf %23 : vector<8x4xf32>
    %25 = math.exp %24 : vector<8x4xf32>
    %cst_19 = arith.constant 1.000000e+00 : f32
    %26 = vector.broadcast %cst_19 : f32 to vector<8x4xf32>
    %27 = arith.addf %26, %25 : vector<8x4xf32>
    %28 = arith.divf %26, %27 : vector<8x4xf32>
    %29 = vector.broadcast %0 : f32 to vector<8x4xf32>
    %30 = arith.mulf %28, %29 : vector<8x4xf32>
    %c0_20 = arith.constant 0 : index
    %c0_21 = arith.constant 0 : index
    %31 = vector.load %arg9[%c0_20, %c0_21] : memref<8x4xf32, #tpu.memory_space<vmem>>, vector<8x4xf32>
    tpu.vector_store %arg9[%c0_20, %c0_21], %30 {strides = array<i32>} : memref<8x4xf32, #tpu.memory_space<vmem>>, vector<8x4xf32>,
    return
  }
  func.func @transform_0(%arg0: i32) -> (i32, i32) {
    %c0_i32 = arith.constant 0 : i32
    %c0_i32_0 = arith.constant 0 : i32
    %c0_i32_1 = arith.constant 0 : i32
    return %c0_i32, %c0_i32_0 : i32, i32
  }
  func.func @transform_1(%arg0: i32) -> (i32, i32) {
    %c0_i32 = arith.constant 0 : i32
    %c0_i32_0 = arith.constant 0 : i32
    return %arg0, %c0_i32 : i32, i32
  }
  func.func @transform_2(%arg0: i32) -> (i32, i32) {
    %c0_i32 = arith.constant 0 : i32
    %c0_i32_0 = arith.constant 0 : i32
    %c0_i32_1 = arith.constant 0 : i32
    return %c0_i32, %c0_i32_0 : i32, i32
  }
  func.func @transform_3(%arg0: i32) -> (i32, i32) {
    %c0_i32 = arith.constant 0 : i32
    %c0_i32_0 = arith.constant 0 : i32
    %c0_i32_1 = arith.constant 0 : i32
    return %c0_i32, %c0_i32_0 : i32, i32
  }
  func.func @transform_4(%arg0: i32) -> (i32, i32) {
    %c0_i32 = arith.constant 0 : i32
    %c0_i32_0 = arith.constant 0 : i32
    %c0_i32_1 = arith.constant 0 : i32
    return %c0_i32, %c0_i32_0 : i32, i32
  }
  func.func @transform_5(%arg0: i32) -> (i32, i32) {
    %c0_i32 = arith.constant 0 : i32
    %c0_i32_0 = arith.constant 0 : i32
    %c0_i32_1 = arith.constant 0 : i32
    return %c0_i32, %c0_i32_0 : i32, i32
  }
  func.func @transform_6(%arg0: i32) -> (i32, i32) {
    %c0_i32 = arith.constant 0 : i32
    %c0_i32_0 = arith.constant 0 : i32
    %c0_i32_1 = arith.constant 0 : i32
    return %c0_i32, %c0_i32_0 : i32, i32
  }
  func.func @transform_7(%arg0: i32) -> (i32, i32) {
    %c0_i32 = arith.constant 0 : i32
    %c0_i32_0 = arith.constant 0 : i32
    %c0_i32_1 = arith.constant 0 : i32
    return %c0_i32, %c0_i32_0 : i32, i32
  }
  func.func @transform_8(%arg0: i32) -> (i32, i32) {
    %c0_i32 = arith.constant 0 : i32
    %c0_i32_0 = arith.constant 0 : i32
    return %arg0, %c0_i32 : i32, i32
  }
}

</mosaic_0001>

<bundles_post_ra>
// kernel: tpu_custom_call.1
= control target key start
LH: loop header
LB: loop body
LE: loop exit
PB: predicated region body
PF: predicated region fallthrough
CT: control target
= control target key end

     0   :  { %14 = vsyncpa [#allocation4], 0  ;;  %s652_s0 = inlined_call_operand.<no memory space> [shape: f32[1,1], index: 0, kind: input, shape index: {}]   ;;  %s653_s1 = inlined_call_operand.vmem [shape: f32[8,8], index: 1, kind: input, shape index: {}]   ;;  %s654_s2 = inlined_call_operand.hbm [shape: bf16[8,128], index: 2, kind: input, shape index: {}]   ;;  %s655_s3 = inlined_call_operand.vmem [shape: f32[1,128], index: 3, kind: input, shape index: {}]   ;;  %s656_s4 = inlined_call_operand.vmem [shape: bf16[128,128], index: 4, kind: input, shape index: {}]   ;;  %s657_s5 = inlined_call_operand.hbm [shape: f32[1,128], index: 5, kind: input, shape index: {}]   ;;  %s658_s6 = inlined_call_operand.vmem [shape: bf16[128,4], index: 6, kind: input, shape index: {}]   ;;  %s659_s7 = inlined_call_operand.vmem [shape: f32[1,4], index: 7, kind: input, shape index: {}]   ;;  %s660_s8 = inlined_call_operand.vmem [shape: f32[8,4], index: 8, kind: output, shape index: {}]  }
   0x1   :  { %15 = vsyncpa [#allocation6], 0  ;;  %s511_s27 = smov [#allocation3]   ;;  %s512_s29 = smov [#allocation5]  }
   0x2   :  { %s26_s28 = sshll.u32 %s511_s27, 4  ;;  %s40_s30 = sshll.u32 %s512_s29, 4  ;;  %s27_s28 = int_to_ptr.vmem [resolvable:$true] %s26_s28  ;;  %s41_s30 = int_to_ptr.vmem [resolvable:$true] %s40_s30 }
   0x3   :  { %s475_s9 = scalar_lea.vmem %s27_s28, 64  ;;  %p480_p1 = scmp.lt.s32.totalorder %s27_s28, %s27_s28 }
   0x4   :  { %p476_p0 = scmp.ne.s32.totalorder %s27_s28, %s475_s9  ;;  %p481_p2 = scmp.lt.s32.totalorder %s475_s9, %s475_s9 }
   0x6   :  { %p482_p3 = por %p481_p2, %p480_p1 }
   0x8   :  { %p483_p4 = pnand %p482_p3, %p476_p0 }
   0xa   :  { %486 = shalt.err (!%p483_p4)
}
   0xb   :  { %29 = dma.hbm_to_vmem [thread:$0]  %s654_s2, 64, %s27_s28, [#allocation4]  }
   0xc   :  { %s495_s12 = scalar_lea.vmem %s41_s30, 16  ;;  %s499_s13 = scalar_lea.vmem %s41_s30, 32 }
   0xd   :  { %p496_p5 = scmp.ne.s32.totalorder %s41_s30, %s495_s12  ;;  %p500_p6 = scmp.lt.s32.totalorder %s41_s30, %s41_s30 }
   0xe   :  { %p501_p7 = scmp.lt.s32.totalorder %s499_s13, %s495_s12 }
  0x10   :  { %p502_p8 = por %p501_p7, %p500_p6 }
  0x12   :  { %p503_p9 = pnand %p502_p8, %p496_p5 }
  0x14   :  { %506 = shalt.err (!%p503_p9)
}
  0x15   :  { %43 = dma.hbm_to_vmem [thread:$0]  %s657_s5, 16, %s41_s30, [#allocation6]  }
  0x16   :  { %507 = dma.done.wait [#allocation4], 64  }
  0x17   :  { %508 = vsyncadd [#allocation4], 4294967232 }
  0x18   :  { %509 = dma.done.wait [#allocation6], 16  }
  0x19   :  { %510 = vsyncadd [#allocation6], 4294967280  ;;  %v513_v0 = vmov 0.0   ;;  %vm514_vm0 = vmmov 0   ;;  %vm70_vm1 = vcmask 1043456   ;;  %v56_v2 = vld [vmem:[%s653_s1] sm:$0xff]  ;;  %v346_v46 = vstv %s652_s0 }
  0x1a   :  { %397 = vmatprep.subr.bf16.mxu0 %v513_v0  ;;  %399 = vmatprep.mubr.msk.bf16.mxu0 %vm514_vm0, %v513_v0  ;;  %v58_v1 = vld [vmem:[#allocation3] sm:$0xf]  ;;  %v57_v4 = vpack.c.bf16 %v56_v2, %v56_v2  ;;  %v447_v5 = vld [vmem:[%s656_s4 + $0x38] sm:$0xff]   ;;  %vm66_vm2 = vcmask 64512   ;;  %v448_v6 = vld [vmem:[%s656_s4 + $0x30] sm:$0xff]   ;;  %vm348_vm3 = vcmask 31744  }
  0x1b   :  { %403 = vmatprep.subr.bf16.mxu1 %v513_v0  ;;  %419 = vmatprep.mubr.msk.bf16.mxu1 %vm514_vm0, %v513_v0  ;;  %v72_v3 = vsel %vm70_vm1, %v58_v1, 0  ;;  %v449_v7 = vld [vmem:[%s656_s4 + $0x28] sm:$0xff]   ;;  %v450_v8 = vld [vmem:[%s656_s4 + $0x20] sm:$0xff]   ;;  %v451_v9 = vld [vmem:[%s656_s4 + $0x18] sm:$0xff]  }
  0x1c   :  { %398 = vmatpush3.bf16.msra.mxu0 %v72_v3  ;;  %404 = vmatpush3.bf16.msra.mxu1 %v447_v5  ;;  %v452_v10 = vld [vmem:[%s656_s4 + $0x10] sm:$0xff]   ;;  %v453_v11 = vld [vmem:[%s656_s4 + $0x8] sm:$0xff]   ;;  %v454_v12 = vld [vmem:[%s656_s4] sm:$0xff]  }
  0x1d   :  { %423 = vmatprep.subr.bf16.mxu0 %v513_v0  ;;  %405 = vmatprep.subr.bf16.mxu1 %v513_v0  ;;  %v455_v13 = vld [vmem:[%s658_s6 + $0x38] sm:$0xff]   ;;  %v456_v14 = vld [vmem:[%s658_s6 + $0x30] sm:$0xff]   ;;  %v457_v15 = vld [vmem:[%s658_s6 + $0x28] sm:$0xff]  }
  0x1e   :  { %v458_v16 = vld [vmem:[%s658_s6 + $0x20] sm:$0xff]   ;;  %v459_v17 = vld [vmem:[%s658_s6 + $0x18] sm:$0xff]   ;;  %v460_v18 = vld [vmem:[%s658_s6 + $0x10] sm:$0xff]  }
  0x1f   :  { %400 = vmatmul.mubr.msk.bf16.vlgmr.msra.gmra.mxu0 %vm66_vm2, %v57_v4  ;;  %v356_v19 = vld [vmem:[%s655_s3] ss:$0 sm:$0xff]  ;;  %v461_v27 = vld [vmem:[%s658_s6 + $0x8] sm:$0xff]   ;;  %v358_v29 = vld [vmem:[#allocation5] ss:$0 sm:$0xff] }
  0x20   :  { %439 = vmatprep.mubr.msk.bf16.mxu0 %vm514_vm0, %v513_v0  ;;  %406 = vmatpush3.bf16.msra.mxu1 %v448_v6  ;;  %v462_v28 = vld [vmem:[%s658_s6] sm:$0xff]  }
  0x21   :  { %407 = vmatprep.subr.bf16.mxu1 %v513_v0  ;;  %424 = vmatpush3.bf16.msra.mxu0 %v455_v13  ;;  %v367_v37 = vld [vmem:[%s659_s7] ss:$0 sm:$0xff] }
  0x22   :  { %425 = vmatprep.subr.bf16.mxu0 %v513_v0 }
  0x24   :  { %408 = vmatpush3.bf16.msra.mxu1 %v449_v7 }
  0x25   :  { %409 = vmatprep.subr.bf16.mxu1 %v513_v0  ;;  %426 = vmatpush3.bf16.msra.mxu0 %v456_v14 }
  0x26   :  { %427 = vmatprep.subr.bf16.mxu0 %v513_v0 }
  0x28   :  { %410 = vmatpush3.bf16.msra.mxu1 %v450_v8 }
  0x29   :  { %411 = vmatprep.subr.bf16.mxu1 %v513_v0  ;;  %428 = vmatpush3.bf16.msra.mxu0 %v457_v15 }
  0x2a   :  { %429 = vmatprep.subr.bf16.mxu0 %v513_v0 }
  0x2c   :  { %412 = vmatpush3.bf16.msra.mxu1 %v451_v9 }
  0x2d   :  { %413 = vmatprep.subr.bf16.mxu1 %v513_v0  ;;  %430 = vmatpush3.bf16.msra.mxu0 %v458_v16 }
  0x2e   :  { %431 = vmatprep.subr.bf16.mxu0 %v513_v0 }
  0x30   :  { %414 = vmatpush3.bf16.msra.mxu1 %v452_v10 }
  0x31   :  { %415 = vmatprep.subr.bf16.mxu1 %v513_v0  ;;  %432 = vmatpush3.bf16.msra.mxu0 %v459_v17 }
  0x32   :  { %433 = vmatprep.subr.bf16.mxu0 %v513_v0 }
  0x34   :  { %416 = vmatpush3.bf16.msra.mxu1 %v453_v11 }
  0x35   :  { %417 = vmatprep.subr.bf16.mxu1 %v513_v0  ;;  %434 = vmatpush3.bf16.msra.mxu0 %v460_v18 }
  0x36   :  { %435 = vmatprep.subr.bf16.mxu0 %v513_v0 }
  0x38   :  { %418 = vmatpush3.bf16.msra.mxu1 %v454_v12 }
  0x39   :  { %436 = vmatpush3.bf16.msra.mxu0 %v461_v27 }
  0x3a   :  { %437 = vmatprep.subr.bf16.mxu0 %v513_v0 }
  0x3d   :  { %438 = vmatpush3.bf16.msra.mxu0 %v462_v28 }
  0xdf   :  { %v108_v20 = vpop.f32.mrf.mxu0 }
  0xe0   :  { %v109_v21 = vadd.f32 %v356_v19, %v108_v20 }
  0xe1   :  { %v401_v22 = vpop.f32.mrf.mxu0 }
  0xe2   :  { %v114_v23 = vmax.f32 %v109_v21, 0.0 }
  0xe3   :  { %v111_v24 = vpop.f32.mrf.mxu0 }
  0xe4   :  { %v115_v25 = vpack.c.bf16 %v114_v23, %v114_v23 }
  0xe5   :  { %v402_v26 = vpop.f32.mrf.mxu0 }
  0xe6   :  { %420 = vmatmul.mubr.bf16.vlgmr.msra.gmra.mxu1 %v115_v25 }
 0x1a6   :  { %v221_v30 = vpop.f32.mrf.mxu1 }
 0x1a7   :  { %v222_v31 = vadd.f32 %v358_v29, %v221_v30 }
 0x1a8   :  { %v421_v32 = vpop.f32.mrf.mxu1 }
 0x1a9   :  { %v227_v33 = vmax.f32 %v222_v31, 0.0 }
 0x1aa   :  { %v224_v34 = vpop.f32.mrf.mxu1 }
 0x1ab   :  { %v228_v35 = vpack.c.bf16 %v227_v33, %v227_v33 }
 0x1ac   :  { %v422_v36 = vpop.f32.mrf.mxu1 }
 0x1ad   :  { %440 = vmatmul.mubr.bf16.vlgmr.msra.gmra.mxu0 %v228_v35 }
 0x26d   :  { %v334_v38 = vpop.f32.mrf.mxu0 }
 0x26e   :  { %v335_v39 = vadd.f32 %v367_v37, %v334_v38 }
 0x26f   :  { %v441_v40 = vpop.f32.mrf.mxu0 }
 0x270   :  { %v376_v41 = vmul.f32 -1.442695, %v335_v39 }
 0x271   :  { %v337_v42 = vpop.f32.mrf.mxu0 }
 0x272   :  { %463 = vpow2.f32 %v376_v41 }
 0x273   :  { %v442_v43 = vpop.f32.mrf.mxu0 }
 0x27f   :  { %v464_v44 = vpop.eup %463 }
 0x280   :  { %v343_v45 = vadd.f32 1.0, %v464_v44 }
 0x282   :  { %465 = vrcp.f32 %v343_v45 }
 0x28f   :  { %v466_v47 = vpop.eup %465 }
 0x290   :  { %v347_v48 = vmul.f32 %v466_v47, %v346_v46 }
 0x292   :  { %349 = vst.msk [vmem:[%s660_s8] sm:$0xff] %vm348_vm3, %v347_v48 }
 0x293   :  { %354 = vsyncpa [#allocation4], 1 }
 0x294   :  { %355 = vsyncpa [#allocation6], 1 }

</bundles_post_ra>
